<compile_context>
chip_gen: v6e
topology: v6e:2x2x1
jax: 0.10.0
libtpu: 0.0.40
codegen_flags: <defaults>
</compile_context>

<pallas_src>
import functools

import jax
import jax.numpy as jnp
from jax import lax
from jax.experimental import pallas as pl
from jax.experimental.pallas import tpu as pltpu

MODEL_CAT_RATE = 0.55   # stands in for args.model_cat_rate
TEMP = 0.2              # temperature used inside cal_gcl_loss

# Tiling targets (blocks fall back to full extents for small arrays; sized so
# double-buffered f32 tiles stay well inside v7x's 64 MiB VMEM).
ROW_TILE_TARGET = 256   # row tile for the per-row, mem-bound kernels
MM_M_TILE = 256
MM_N_TILE = 256         # multiple of 128 (lane-dense output slabs)
MM_K_TILE = 512         # multiple of 128
LSE_N_TILE = 512        # multiple of 8


def _row_tile(n, target=ROW_TILE_TARGET):
    return n if n <= target else target


def _k_tile(k, target=MM_K_TILE):
    if k <= target:
        return k
    t = (target // 128) * 128
    while t >= 128:
        if k % t == 0:         # only tile K when it divides cleanly (no padded
            return t           # K contributions in the accumulation)
        t -= 128
    return k                   # fall back to full K


# ----------------------------------------------------------------------------
# Kernel 1: fused embedding combination
#   out = pre + id + rate * l2norm(img, dim=1) + rate * l2norm(txt, dim=1)
# ----------------------------------------------------------------------------
def _fuse_kernel(rate, pre_ref, idw_ref, img_ref, txt_ref, out_ref):
    img = img_ref[...].astype(jnp.float32)
    txt = txt_ref[...].astype(jnp.float32)
    # F.normalize(p=2, dim=1) semantics: x / max(||x||_2, eps), eps = 1e-12
    img_n = jnp.maximum(jnp.sqrt(jnp.sum(img * img, axis=1, keepdims=True)), 1e-12)
    txt_n = jnp.maximum(jnp.sqrt(jnp.sum(txt * txt, axis=1, keepdims=True)), 1e-12)
    out = (pre_ref[...].astype(jnp.float32) + idw_ref[...].astype(jnp.float32)
           + rate * (img / img_n) + rate * (txt / txt_n))
    out_ref[...] = out.astype(out_ref.dtype)


def fuse_embeddings(pre, idw, img, txt, rate):
    n, d = pre.shape
    tr = _row_tile(n)
    spec = pl.BlockSpec((tr, d), lambda i: (i, 0))
    return pl.pallas_call(
        functools.partial(_fuse_kernel, rate),
        out_shape=jax.ShapeDtypeStruct((n, d), pre.dtype),
        grid=(pl.cdiv(n, tr),),
        in_specs=[spec, spec, spec, spec],
        out_specs=spec,
        compiler_params=pltpu.CompilerParams(dimension_semantics=("parallel",)),
    )(pre, idw, img, txt)


# ----------------------------------------------------------------------------
# Kernel 2: fused multi-layer transform chain (torch Linear + LeakyReLU(0.5)
# + residual, applied L times in one kernel; weights resident in VMEM).
#   per layer: x <- leaky_relu(x @ W_l.T + b_l, 0.5) + x
#   return_mean=True additionally returns mean over [x_in, x_1, ..., x_L]
#   (exactly the stack(...).mean(dim=1) used in cal_gcl_loss for L=2).
# ----------------------------------------------------------------------------
def _trans_chain_kernel(num_layers, return_mean, x_ref, w_ref, b_ref, out_ref):
    x = x_ref[...].astype(jnp.float32)
    acc = x
    for l in range(num_layers):
        # contract x's last dim with W's last dim == x @ W_l.T (no XLU transpose)
        y = lax.dot_general(x, w_ref[l], (((1,), (1,)), ((), ())),
                            preferred_element_type=jnp.float32) + b_ref[l]
        x = jnp.where(y >= 0.0, y, 0.5 * y) + x          # LeakyReLU(0.5) + residual
        acc = acc + x
    res = acc * (1.0 / (num_layers + 1)) if return_mean else x
    out_ref[...] = res.astype(out_ref.dtype)


def trans_chain(x, w_stack, b_stack, *, return_mean=False):
    n, d = x.shape
    num_layers = w_stack.shape[0]
    tr = _row_tile(n)
    row_spec = pl.BlockSpec((tr, d), lambda i: (i, 0))
    return pl.pallas_call(
        functools.partial(_trans_chain_kernel, num_layers, return_mean),
        out_shape=jax.ShapeDtypeStruct((n, d), x.dtype),
        grid=(pl.cdiv(n, tr),),
        in_specs=[row_spec,
                  pl.BlockSpec((num_layers, d, d), lambda i: (0, 0, 0)),   # resident W
                  pl.BlockSpec((num_layers, 1, d), lambda i: (0, 0, 0))],  # resident b
        out_specs=row_spec,
        compiler_params=pltpu.CompilerParams(dimension_semantics=("parallel",)),
    )(x, w_stack, b_stack)


# ----------------------------------------------------------------------------
# Kernel 3: tiled dense matmul (adj / SVD propagation), K-reduction with VMEM
# accumulator, init/finalize via pl.when.
# ----------------------------------------------------------------------------
def _matmul_kernel(a_ref, b_ref, o_ref, acc_ref):
    @pl.when(pl.program_id(2) == 0)
    def _():
        acc_ref[...] = jnp.zeros_like(acc_ref)

    acc_ref[...] += jnp.dot(a_ref[...], b_ref[...],
                            preferred_element_type=jnp.float32)

    @pl.when(pl.program_id(2) == pl.num_programs(2) - 1)
    def _():
        o_ref[...] = acc_ref[...].astype(o_ref.dtype)


def matmul(a, b):
    m, k = a.shape
    k2, n = b.shape
    assert k == k2
    tm = m if m <= MM_M_TILE else MM_M_TILE
    tn = n if n <= MM_N_TILE else MM_N_TILE
    tk = _k_tile(k)
    return pl.pallas_call(
        _matmul_kernel,
        out_shape=jax.ShapeDtypeStruct((m, n), jnp.float32),
        grid=(pl.cdiv(m, tm), pl.cdiv(n, tn), pl.cdiv(k, tk)),
        in_specs=[pl.BlockSpec((tm, tk), lambda i, j, kk: (i, kk)),
                  pl.BlockSpec((tk, tn), lambda i, j, kk: (kk, j))],
        out_specs=pl.BlockSpec((tm, tn), lambda i, j, kk: (i, j)),
        scratch_shapes=[pltpu.VMEM((tm, tn), jnp.float32)],
        compiler_params=pltpu.CompilerParams(
            dimension_semantics=("parallel", "parallel", "arbitrary")),
    )(a, b)


# ----------------------------------------------------------------------------
# Kernel 4: streaming contrastive negative score
#   lse_i = logsumexp_j( (G_sel @ E.T)_{ij} / temp )
# Online (running max / running sum) over tiles of E; padded tail columns are
# masked to -inf before the reduction.
# ----------------------------------------------------------------------------
def _lse_kernel(n_total, tile_n, inv_temp,
                g_ref, e_ref, out_ref, m_scr, l_scr):
    j = pl.program_id(0)

    @pl.when(j == 0)
    def _():
        m_scr[...] = jnp.full(m_scr.shape, -jnp.inf, jnp.float32)
        l_scr[...] = jnp.zeros(l_scr.shape, jnp.float32)

    # contract last dims: (m, d) x (tile_n, d) -> (m, tile_n), no XLU transpose
    s = lax.dot_general(g_ref[...], e_ref[...], (((1,), (1,)), ((), ())),
                        preferred_element_type=jnp.float32) * inv_temp
    col = j * tile_n + lax.broadcasted_iota(jnp.int32, s.shape, 1)
    s = jnp.where(col < n_total, s, -jnp.inf)

    m_new = jnp.maximum(m_scr[...], jnp.max(s, axis=1, keepdims=True))
    alpha = jnp.exp(m_scr[...] - m_new)
    l_scr[...] = alpha * l_scr[...] + jnp.sum(jnp.exp(s - m_new),
                                              axis=1, keepdims=True)
    m_scr[...] = m_new

    @pl.when(j == pl.num_programs(0) - 1)
    def _():
        out_ref[...] = m_scr[...] + jnp.log(l_scr[...])


def logsumexp_scores(g_sel, e_all, temp):
    m, d = g_sel.shape
    n, _ = e_all.shape
    te = n if n <= LSE_N_TILE else LSE_N_TILE
    out = pl.pallas_call(
        functools.partial(_lse_kernel, n, te, 1.0 / temp),
        out_shape=jax.ShapeDtypeStruct((m, 1), jnp.float32),
        grid=(pl.cdiv(n, te),),
        in_specs=[pl.BlockSpec((m, d), lambda j: (0, 0)),     # resident queries
                  pl.BlockSpec((te, d), lambda j: (j, 0))],   # streamed table
        out_specs=pl.BlockSpec((m, 1), lambda j: (0, 0)),
        scratch_shapes=[pltpu.VMEM((m, 1), jnp.float32),
                        pltpu.VMEM((m, 1), jnp.float32)],
        compiler_params=pltpu.CompilerParams(dimension_semantics=("arbitrary",)),
    )(g_sel, e_all)
    return out[:, 0]


# ----------------------------------------------------------------------------
# Parameter init (deterministic, synthetic)
# ----------------------------------------------------------------------------
def _xavier_uniform(key, shape):
    fan_out, fan_in = shape
    bound = (6.0 / (fan_in + fan_out)) ** 0.5
    return jax.random.uniform(key, shape, jnp.float32, -bound, bound)


def init_params(key, n_users, n_items, d, gnn_layer):
    keys = jax.random.split(key, 4 + 4 * gnn_layer)
    params = {
        'user_id':  _xavier_uniform(keys[0], (n_users, d)),
        'item_id':  _xavier_uniform(keys[1], (n_items, d)),
        'user_pre': _xavier_uniform(keys[2], (n_users, d)),
        'item_pre': _xavier_uniform(keys[3], (n_items, d)),
        'user_W': [], 'user_b': [], 'item_W': [], 'item_b': [],
    }
    bound = 1.0 / (d ** 0.5)   # torch nn.Linear default init bound
    for l in range(gnn_layer):
        k0, k1, k2, k3 = keys[4 + 4 * l: 8 + 4 * l]
        params['user_W'].append(jax.random.uniform(k0, (d, d), jnp.float32, -bound, bound))
        params['user_b'].append(jax.random.uniform(k1, (d,), jnp.float32, -bound, bound))
        params['item_W'].append(jax.random.uniform(k2, (d, d), jnp.float32, -bound, bound))
        params['item_b'].append(jax.random.uniform(k3, (d,), jnp.float32, -bound, bound))
    return params


def _stack_wb(w_list, b_list):
    w = jnp.stack(w_list)                  # (L, d, d)
    b = jnp.stack(b_list)[:, None, :]      # (L, 1, d)
    return w, b


# ----------------------------------------------------------------------------
# Model forward (mirrors Student_MLPGCL.forward with is_test=False)
# ----------------------------------------------------------------------------
def cal_gcl_loss(params, adj_norm, ut, vt, u_mul_s, v_mul_s, uids, iids):
    # cal_gcl_loss in the reference hardcodes layers 0 and 1.
    Wu, bu = _stack_wb(params['user_W'][:2], params['user_b'][:2])
    Wi, bi = _stack_wb(params['item_W'][:2], params['item_b'][:2])

    E_u0 = params['user_pre'] + params['user_id']
    E_i0 = params['item_pre'] + params['item_id']
    # NOTE: the reference runs two layer_forward passes on user/item embeddings
    # here whose outputs are never consumed; they do not affect the loss and
    # are omitted.

    E_u1 = matmul(adj_norm, E_i0)          # torch.sparse.mm -> dense matmul
    E_i1 = matmul(adj_norm.T, E_u0)
    G_u1 = matmul(u_mul_s, matmul(vt, E_i0))
    G_i1 = matmul(v_mul_s, matmul(ut, E_u0))

    # Fused: mean over [X1, layer0(X1), layer1(layer0(X1))] computed in one
    # kernel pass per tensor (== stack([X1,X2,X3],dim=1).mean(dim=1)).
    E_u = trans_chain(E_u1, Wu, bu, return_mean=True)
    E_i = trans_chain(E_i1, Wi, bi, return_mean=True)
    G_u = trans_chain(G_u1, Wu, bu, return_mean=True)
    G_i = trans_chain(G_i1, Wi, bi, return_mean=True)

    Gu_sel = jnp.take(G_u, uids, axis=0)
    Gi_sel = jnp.take(G_i, iids, axis=0)
    neg_score = (logsumexp_scores(Gu_sel, E_u, TEMP).mean()
                 + logsumexp_scores(Gi_sel, E_i, TEMP).mean())
    pos_score = (jnp.clip((Gu_sel * jnp.take(E_u, uids, axis=0)).sum(axis=1) / TEMP,
                          -5.0, 5.0).mean()
                 + jnp.clip((Gi_sel * jnp.take(E_i, iids, axis=0)).sum(axis=1) / TEMP,
                            -5.0, 5.0).mean())
    return -pos_score + neg_score


def forward(params, adj_norm, image_item_embeds, text_item_embeds,
            image_user_embeds, text_user_embeds, ut, vt, u_mul_s, v_mul_s,
            uids, iids, gnn_layer, is_test=False):
    user_embedding = fuse_embeddings(params['user_pre'], params['user_id'],
                                     image_user_embeds, text_user_embeds, MODEL_CAT_RATE)
    item_embedding = fuse_embeddings(params['item_pre'], params['item_id'],
                                     image_item_embeds, text_item_embeds, MODEL_CAT_RATE)
    Wu, bu = _stack_wb(params['user_W'][:gnn_layer], params['user_b'][:gnn_layer])
    Wi, bi = _stack_wb(params['item_W'][:gnn_layer], params['item_b'][:gnn_layer])

    if is_test:
        return (trans_chain(user_embedding, Wu, bu),
                trans_chain(item_embedding, Wi, bi))

    gcl_loss = cal_gcl_loss(params, adj_norm, ut, vt, u_mul_s, v_mul_s, uids, iids)
    user_out = trans_chain(user_embedding, Wu, bu)   # all gnn_layer layers fused
    item_out = trans_chain(item_embedding, Wi, bi)
    return user_out, item_out, gcl_loss


# ----------------------------------------------------------------------------
if __name__ == "__main__":
    # small but lane-dense shapes (d multiple of 128)
    n_users, n_items, d, gnn_layer, rank = 48, 64, 128, 2, 8

    key = jax.random.PRNGKey(0)
    k_params, k_adj, k_svd, k_feats = jax.random.split(key, 4)

    params = init_params(k_params, n_users, n_items, d, gnn_layer)

    adj_norm = jax.random.uniform(k_adj, (n_users, n_items), jnp.float32)
    ks = jax.random.split(k_svd, 4)
    ut = jax.random.normal(ks[0], (rank, n_users), jnp.float32) * 0.1
    vt = jax.random.normal(ks[1], (rank, n_items), jnp.float32) * 0.1
    u_mul_s = jax.random.normal(ks[2], (n_users, rank), jnp.float32) * 0.1
    v_mul_s = jax.random.normal(ks[3], (n_items, rank), jnp.float32) * 0.1

    kf = jax.random.split(k_feats, 4)
    image_item_embeds = jax.random.normal(kf[0], (n_items, d), jnp.float32)
    text_item_embeds = jax.random.normal(kf[1], (n_items, d), jnp.float32)
    image_user_embeds = jax.random.normal(kf[2], (n_users, d), jnp.float32)
    text_user_embeds = jax.random.normal(kf[3], (n_users, d), jnp.float32)

    users = [0, 3, 5, 7]
    pos_items = [1, 2]
    neg_items = [4, 9]
    uids = jnp.asarray(users, dtype=jnp.int32)
    iids = jnp.asarray(pos_items + neg_items, dtype=jnp.int32)

    user_out, item_out, gcl_loss = forward(
        params, adj_norm, image_item_embeds, text_item_embeds,
        image_user_embeds, text_user_embeds, ut, vt, u_mul_s, v_mul_s,
        uids, iids, gnn_layer, is_test=False)

    jax.block_until_ready((user_out, item_out, gcl_loss))
    assert user_out.shape == (n_users, d)
    assert item_out.shape == (n_items, d)
    assert gcl_loss.shape == ()
    assert bool(jnp.isfinite(gcl_loss))
    print("KERNEL_OK")
</pallas_src>

<mosaic_0001>
module attributes {stable_mosaic.version = 11 : i64} {
  func.func @_fuse_kernel(%arg0: i32, %arg1: memref<48x128xf32, #tpu.memory_space<vmem>>, %arg2: memref<48x128xf32, #tpu.memory_space<vmem>>, %arg3: memref<48x128xf32, #tpu.memory_space<vmem>>, %arg4: memref<48x128xf32, #tpu.memory_space<vmem>>, %arg5: memref<48x128xf32, #tpu.memory_space<vmem>>) attributes {dimension_semantics = [#tpu.dimension_semantics<parallel>], iteration_bounds = array<i64: 1>, scalar_prefetch = 0 : i64, scratch_operands = 0 : i64, tpu.core_type = #tpu.core_type<tc>, window_params = [{transform_indices = @transform_0, window_bounds = array<i64: 48, 128>}, {transform_indices = @transform_1, window_bounds = array<i64: 48, 128>}, {transform_indices = @transform_2, window_bounds = array<i64: 48, 128>}, {transform_indices = @transform_3, window_bounds = array<i64: 48, 128>}, {transform_indices = @transform_4, window_bounds = array<i64: 48, 128>}]} {
    %c0 = arith.constant 0 : index
    %c0_0 = arith.constant 0 : index
    %0 = vector.load %arg3[%c0, %c0_0] : memref<48x128xf32, #tpu.memory_space<vmem>>, vector<48x128xf32>
    %c0_1 = arith.constant 0 : index
    %c0_2 = arith.constant 0 : index
    %1 = vector.load %arg4[%c0_1, %c0_2] : memref<48x128xf32, #tpu.memory_space<vmem>>, vector<48x128xf32>
    %2 = arith.mulf %0, %0 : vector<48x128xf32>
    %cst = arith.constant dense<0.000000e+00> : vector<48xf32>
    %3 = vector.multi_reduction <add>, %2, %cst [1] : vector<48x128xf32> to vector<48xf32>
    %4 = vector.shape_cast %3 : vector<48xf32> to vector<48x1xf32>
    %5 = math.sqrt %4 : vector<48x1xf32>
    %cst_3 = arith.constant 9.99999996E-13 : f32
    %6 = vector.broadcast %cst_3 : f32 to vector<48x1xf32>
    %7 = arith.maximumf %5, %6 : vector<48x1xf32>
    %8 = arith.mulf %1, %1 : vector<48x128xf32>
    %cst_4 = arith.constant dense<0.000000e+00> : vector<48xf32>
    %9 = vector.multi_reduction <add>, %8, %cst_4 [1] : vector<48x128xf32> to vector<48xf32>
    %10 = vector.shape_cast %9 : vector<48xf32> to vector<48x1xf32>
    %11 = math.sqrt %10 : vector<48x1xf32>
    %cst_5 = arith.constant 9.99999996E-13 : f32
    %12 = vector.broadcast %cst_5 : f32 to vector<48x1xf32>
    %13 = arith.maximumf %11, %12 : vector<48x1xf32>
    %c0_6 = arith.constant 0 : index
    %c0_7 = arith.constant 0 : index
    %14 = vector.load %arg1[%c0_6, %c0_7] : memref<48x128xf32, #tpu.memory_space<vmem>>, vector<48x128xf32>
    %c0_8 = arith.constant 0 : index
    %c0_9 = arith.constant 0 : index
    %15 = vector.load %arg2[%c0_8, %c0_9] : memref<48x128xf32, #tpu.memory_space<vmem>>, vector<48x128xf32>
    %16 = arith.addf %14, %15 : vector<48x128xf32>
    %17 = vector.broadcast %7 : vector<48x1xf32> to vector<48x128xf32>
    %18 = arith.divf %0, %17 : vector<48x128xf32>
    %cst_10 = arith.constant 5.500000e-01 : f32
    %19 = vector.broadcast %cst_10 : f32 to vector<48x128xf32>
    %20 = arith.mulf %19, %18 : vector<48x128xf32>
    %21 = arith.addf %16, %20 : vector<48x128xf32>
    %22 = vector.broadcast %13 : vector<48x1xf32> to vector<48x128xf32>
    %23 = arith.divf %1, %22 : vector<48x128xf32>
    %cst_11 = arith.constant 5.500000e-01 : f32
    %24 = vector.broadcast %cst_11 : f32 to vector<48x128xf32>
    %25 = arith.mulf %24, %23 : vector<48x128xf32>
    %26 = arith.addf %21, %25 : vector<48x128xf32>
    %c0_12 = arith.constant 0 : index
    %c0_13 = arith.constant 0 : index
    %27 = vector.load %arg5[%c0_12, %c0_13] : memref<48x128xf32, #tpu.memory_space<vmem>>, vector<48x128xf32>
    tpu.vector_store %arg5[%c0_12, %c0_13], %26 {strides = array<i32>} : memref<48x128xf32, #tpu.memory_space<vmem>>, vector<48x128xf32>,
    return
  }
  func.func @transform_0(%arg0: i32) -> (i32, i32) {
    %c0_i32 = arith.constant 0 : i32
    %c0_i32_0 = arith.constant 0 : i32
    return %arg0, %c0_i32 : i32, i32
  }
  func.func @transform_1(%arg0: i32) -> (i32, i32) {
    %c0_i32 = arith.constant 0 : i32
    %c0_i32_0 = arith.constant 0 : i32
    return %arg0, %c0_i32 : i32, i32
  }
  func.func @transform_2(%arg0: i32) -> (i32, i32) {
    %c0_i32 = arith.constant 0 : i32
    %c0_i32_0 = arith.constant 0 : i32
    return %arg0, %c0_i32 : i32, i32
  }
  func.func @transform_3(%arg0: i32) -> (i32, i32) {
    %c0_i32 = arith.constant 0 : i32
    %c0_i32_0 = arith.constant 0 : i32
    return %arg0, %c0_i32 : i32, i32
  }
  func.func @transform_4(%arg0: i32) -> (i32, i32) {
    %c0_i32 = arith.constant 0 : i32
    %c0_i32_0 = arith.constant 0 : i32
    return %arg0, %c0_i32 : i32, i32
  }
}

</mosaic_0001>

<bundles_post_ra>
// kernel: tpu_custom_call.1
= control target key start
LH: loop header
LB: loop body
LE: loop exit
PB: predicated region body
PF: predicated region fallthrough
CT: control target
= control target key end

     0   :  { %9 = vsyncpa [#allocation3], 0  ;;  %s670_s0 = inlined_call_operand.hbm [shape: f32[48,128], index: 0, kind: input, shape index: {}]   ;;  %s671_s1 = inlined_call_operand.hbm [shape: f32[48,128], index: 1, kind: input, shape index: {}]   ;;  %s672_s2 = inlined_call_operand.hbm [shape: f32[48,128], index: 2, kind: input, shape index: {}]   ;;  %s673_s3 = inlined_call_operand.hbm [shape: f32[48,128], index: 3, kind: input, shape index: {}]   ;;  %s674_s4 = inlined_call_operand.hbm [shape: f32[48,128], index: 4, kind: output, shape index: {}]  }
   0x1   :  { %10 = vsyncpa [#allocation6], 0 }
   0x2   :  { %11 = vsyncpa [#allocation9], 0 }
   0x3   :  { %12 = vsyncpa [#allocation4], 0  ;;  %s471_s15 = smov [#allocation5]   ;;  %s472_s17 = smov [#allocation2]  }
   0x4   :  { %s30_s16 = sshll.u32 %s471_s15, 4  ;;  %s18_s18 = sshll.u32 %s472_s17, 4  ;;  %s31_s16 = int_to_ptr.vmem [resolvable:$true] %s30_s16  ;;  %s19_s18 = int_to_ptr.vmem [resolvable:$true] %s18_s18 }
   0x5   :  { %s371_s19 = scalar_lea.vmem %s31_s16, 768  ;;  %p376_p1 = scmp.lt.s32.totalorder %s31_s16, %s31_s16 }
   0x6   :  { %p372_p0 = scmp.ne.s32.totalorder %s31_s16, %s371_s19  ;;  %p377_p2 = scmp.lt.s32.totalorder %s371_s19, %s371_s19 }
   0x8   :  { %p378_p3 = por %p377_p2, %p376_p1 }
   0xa   :  { %p379_p4 = pnand %p378_p3, %p372_p0 }
   0xc   :  { %382 = shalt.err (!%p379_p4)
}
   0xd   :  { %s473_s20 = smov 128   ;;  %s474_s21 = smov 8  }
   0xe   :  { %36 = dma.hbm_to_vmem [thread:$0]  %s671_s1, 768, %s31_s16, [#allocation6], %s473_s20, %s473_s20, %s474_s21  }
   0xf   :  { %s391_s24 = scalar_lea.vmem %s19_s18, 768  ;;  %p396_p6 = scmp.lt.s32.totalorder %s19_s18, %s19_s18 }
  0x10   :  { %p392_p5 = scmp.ne.s32.totalorder %s19_s18, %s391_s24  ;;  %p397_p7 = scmp.lt.s32.totalorder %s391_s24, %s391_s24 }
  0x12   :  { %p398_p8 = por %p397_p7, %p396_p6 }
  0x14   :  { %p399_p9 = pnand %p398_p8, %p392_p5 }
  0x16   :  { %402 = shalt.err (!%p399_p9)
}
  0x17   :  { %24 = dma.hbm_to_vmem [thread:$0]  %s670_s0, 768, %s19_s18, [#allocation3], %s473_s20, %s473_s20, %s474_s21  }
  0x18   :  { %s475_s27 = smov [#allocation7]   ;;  %s476_s29 = smov [#allocation8]  }
  0x19   :  { %s42_s28 = sshll.u32 %s475_s27, 4  ;;  %s54_s30 = sshll.u32 %s476_s29, 4  ;;  %s43_s28 = int_to_ptr.vmem [resolvable:$true] %s42_s28  ;;  %s55_s30 = int_to_ptr.vmem [resolvable:$true] %s54_s30 }
  0x1a   :  { %s411_s1 = scalar_lea.vmem %s43_s28, 768  ;;  %p416_p11 = scmp.lt.s32.totalorder %s43_s28, %s43_s28 }
  0x1b   :  { %p412_p10 = scmp.ne.s32.totalorder %s43_s28, %s411_s1  ;;  %p417_p12 = scmp.lt.s32.totalorder %s411_s1, %s411_s1 }
  0x1d   :  { %p418_p13 = por %p417_p12, %p416_p11 }
  0x1f   :  { %p419_p0 = pnand %p418_p13, %p412_p10 }
  0x21   :  { %422 = shalt.err (!%p419_p0)
}
  0x22   :  { %48 = dma.hbm_to_vmem [thread:$0]  %s672_s2, 768, %s43_s28, [#allocation6], %s473_s20, %s473_s20, %s474_s21  }
  0x23   :  { %s431_s0 = scalar_lea.vmem %s55_s30, 768  ;;  %p436_p2 = scmp.lt.s32.totalorder %s55_s30, %s55_s30 }
  0x24   :  { %p432_p1 = scmp.ne.s32.totalorder %s55_s30, %s431_s0  ;;  %p437_p3 = scmp.lt.s32.totalorder %s431_s0, %s431_s0 }
  0x26   :  { %p438_p4 = por %p437_p3, %p436_p2 }
  0x28   :  { %p439_p5 = pnand %p438_p4, %p432_p1 }
  0x2a   :  { %442 = shalt.err (!%p439_p5)
}
  0x2b   :  { %60 = dma.hbm_to_vmem [thread:$0]  %s673_s3, 768, %s55_s30, [#allocation9], %s473_s20, %s473_s20, %s474_s21  }
  0x2c   :  { %463 = dma.done.wait [#allocation3], 768  }
  0x2d   :  { %464 = vsyncadd [#allocation3], 4294966528 }
  0x2e   :  { %465 = dma.done.wait [#allocation6], 1536  }
  0x2f   :  { %466 = vsyncadd [#allocation6], 4294965760 }
  0x30   :  { %467 = dma.done.wait [#allocation9], 768  }
  0x31   :  { %468 = vsyncadd [#allocation9], 4294966528  ;;  %v527_v0 = vld [vmem:[#allocation7 + $0x10] sm:$0xff]  ;;  %v529_v1 = vld [vmem:[#allocation7] sm:$0xff]  ;;  %s477_s2 = smov [#allocation10]  }
  0x32   :  { %v531_v2 = vld [vmem:[#allocation7 + $0x18] sm:$0xff]  ;;  %v87_v3 = vmul.f32 %v527_v0, %v527_v0  ;;  %v85_v4 = vmul.f32 %v529_v1, %v529_v1  ;;  %v537_v5 = vld [vmem:[#allocation7 + $0x8] sm:$0xff]  ;;  %v545_v9 = vld [vmem:[#allocation7 + $0x20] sm:$0xff]  ;;  %s294_s3 = sshll.u32 %s477_s2, 4  ;;  %s295_s3 = int_to_ptr.vmem [resolvable:$true] %s294_s3 }
  0x33   :  { %v88_v6 = vmul.f32 %v531_v2, %v531_v2  ;;  %v86_v7 = vmul.f32 %v537_v5, %v537_v5  ;;  %v543_v8 = vld [vmem:[#allocation7 + $0x28] sm:$0xff]  ;;  %v89_v11 = vmul.f32 %v545_v9, %v545_v9  ;;  %v551_v12 = vld [vmem:[#allocation8 + $0x8] sm:$0xff]  ;;  %v553_v13 = vld [vmem:[#allocation8] sm:$0xff]  ;;  %s443_s9 = scalar_lea.vmem %s295_s3, 768  ;;  %p448_p7 = scmp.lt.s32.totalorder %s295_s3, %s295_s3 }
  0x34   :  { %95 = vadd.xlane.f32.xlu1 %v87_v3  ;;  %91 = vadd.xlane.f32.xlu0 %v85_v4  ;;  %v90_v10 = vmul.f32 %v543_v8, %v543_v8  ;;  %v152_v14 = vmul.f32 %v551_v12, %v551_v12  ;;  %v151_v15 = vmul.f32 %v553_v13, %v553_v13  ;;  %v559_v16 = vld [vmem:[#allocation8 + $0x18] sm:$0xff]  ;;  %v561_v17 = vld [vmem:[#allocation8 + $0x10] sm:$0xff]  ;;  %v567_v20 = vld [vmem:[#allocation8 + $0x28] sm:$0xff]  ;;  %p444_p6 = scmp.ne.s32.totalorder %s295_s3, %s443_s9  ;;  %p449_p8 = scmp.lt.s32.totalorder %s443_s9, %s443_s9 }
  0x35   :  { %v154_v18 = vmul.f32 %v559_v16, %v559_v16  ;;  %v153_v19 = vmul.f32 %v561_v17, %v561_v17  ;;  %v569_v21 = vld [vmem:[#allocation8 + $0x20] sm:$0xff]  ;;  %v156_v22 = vmul.f32 %v567_v20, %v567_v20 }
  0x36   :  { %v155_v23 = vmul.f32 %v569_v21, %v569_v21  ;;  %p450_p9 = por %p449_p8, %p448_p7 }
  0x38   :  { %97 = vadd.xlane.f32.xlu1 %v88_v6  ;;  %93 = vadd.xlane.f32.xlu0 %v86_v7  ;;  %p451_p10 = pnand %p450_p9, %p444_p6 }
  0x3c   :  { %101 = vadd.xlane.f32.xlu1 %v90_v10  ;;  %99 = vadd.xlane.f32.xlu0 %v89_v11 }
  0x40   :  { %159 = vadd.xlane.f32.xlu1 %v152_v14  ;;  %157 = vadd.xlane.f32.xlu0 %v151_v15 }
  0x44   :  { %163 = vadd.xlane.f32.xlu1 %v154_v18  ;;  %161 = vadd.xlane.f32.xlu0 %v153_v19 }
  0x48   :  { %167 = vadd.xlane.f32.xlu1 %v156_v22  ;;  %165 = vadd.xlane.f32.xlu0 %v155_v23 }
  0xbd   :  { %v96_v24 = vpop.xlane.xlu1 %95  ;;  %v92_v25 = vpop.xlane.xlu0 %91 }
  0xbe   :  { %315 = vrsqrt.f32 %v96_v24  ;;  %vm119_vm0 = vcmp.eq.f32.partialorder %v96_v24, inf  ;;  %vm121_vm1 = vcmp.eq.f32.partialorder %v96_v24, 0.0  ;;  %v122_v35 = vand.u32 2147483648, %v96_v24 }
  0xbf   :  { %317 = vrsqrt.f32 %v92_v25  ;;  %vm105_vm2 = vcmp.eq.f32.partialorder %v92_v25, inf  ;;  %vm107_vm3 = vcmp.eq.f32.partialorder %v92_v25, 0.0  ;;  %v108_v39 = vand.u32 2147483648, %v92_v25 }
  0xc1   :  { %v98_v26 = vpop.xlane.xlu1 %97  ;;  %v94_v27 = vpop.xlane.xlu0 %93 }
  0xc2   :  { %319 = vrsqrt.f32 %v98_v26  ;;  %vm126_vm4 = vcmp.eq.f32.partialorder %v98_v26, inf  ;;  %vm128_vm5 = vcmp.eq.f32.partialorder %v98_v26, 0.0  ;;  %v129_v45 = vand.u32 2147483648, %v98_v26 }
  0xc3   :  { %321 = vrsqrt.f32 %v94_v27  ;;  %vm112_vm6 = vcmp.eq.f32.partialorder %v94_v27, inf  ;;  %vm114_vm7 = vcmp.eq.f32.partialorder %v94_v27, 0.0  ;;  %v115_v48 = vand.u32 2147483648, %v94_v27 }
  0xc5   :  { %v575_v28 = vpop.xlane.xlu1 %101  ;;  %v577_v29 = vpop.xlane.xlu0 %99 }
  0xc6   :  { %323 = vrsqrt.f32 %v575_v28  ;;  %vm140_vm8 = vcmp.eq.f32.partialorder %v575_v28, inf  ;;  %vm142_vm9 = vcmp.eq.f32.partialorder %v575_v28, 0.0  ;;  %v143_v56 = vand.u32 2147483648, %v575_v28 }
  0xc7   :  { %325 = vrsqrt.f32 %v577_v29  ;;  %vm133_vm10 = vcmp.eq.f32.partialorder %v577_v29, inf  ;;  %vm135_vm11 = vcmp.eq.f32.partialorder %v577_v29, 0.0  ;;  %v136_v4 = vand.u32 2147483648, %v577_v29 }
  0xc9   :  { %v581_v30 = vpop.xlane.xlu1 %159  ;;  %v583_v31 = vpop.xlane.xlu0 %157 }
  0xca   :  { %327 = vrsqrt.f32 %v581_v30  ;;  %vm178_vm12 = vcmp.eq.f32.partialorder %v581_v30, inf  ;;  %vm180_vm13 = vcmp.eq.f32.partialorder %v581_v30, 0.0  ;;  %v181_v15 = vand.u32 2147483648, %v581_v30 }
  0xcb   :  { %v316_v32 = vpop.eup %315  ;;  %329 = vrsqrt.f32 %v583_v31  ;;  %vm171_vm14 = vcmp.eq.f32.partialorder %v583_v31, inf  ;;  %vm173_vm15 = vcmp.eq.f32.partialorder %v583_v31, 0.0  ;;  %v174_v22 = vand.u32 2147483648, %v583_v31 }
  0xcc   :  { %v318_v33 = vpop.eup %317  ;;  %v118_v34 = vmul.f32 %v316_v32, %v96_v24 }
  0xcd   :  { %v104_v36 = vmul.f32 %v318_v33, %v92_v25  ;;  %v587_v37 = vpop.xlane.xlu1 %163  ;;  %v589_v38 = vpop.xlane.xlu0 %161 }
  0xce   :  { %331 = vrsqrt.f32 %v587_v37  ;;  %v120_v46 = vsel %vm119_vm0, %v96_v24, %v118_v34  ;;  %vm192_vm0 = vcmp.eq.f32.partialorder %v587_v37, inf }
  0xcf   :  { %v320_v40 = vpop.eup %319  ;;  %v106_v41 = vsel %vm105_vm2, %v92_v25, %v104_v36  ;;  %333 = vrsqrt.f32 %v589_v38  ;;  %v123_v58 = vsel %vm121_vm1, %v122_v35, %v120_v46  ;;  %vm194_vm1 = vcmp.eq.f32.partialorder %v587_v37, 0.0 }
  0xd0   :  { %v322_v42 = vpop.eup %321  ;;  %v109_v43 = vsel %vm107_vm3, %v108_v39, %v106_v41  ;;  %v125_v44 = vmul.f32 %v320_v40, %v98_v26  ;;  %v147_v7 = vmax.f32 %v123_v58, 1e-12  ;;  %v195_v39 = vand.u32 2147483648, %v587_v37 }
  0xd1   :  { %v111_v47 = vmul.f32 %v322_v42, %v94_v27  ;;  %v594_v49 = vpop.xlane.xlu1 %167  ;;  %v145_v50 = vmax.f32 %v109_v43, 1e-12  ;;  %v598_v52 = vpop.xlane.xlu0 %165  ;;  %vm185_vm2 = vcmp.eq.f32.partialorder %v589_v38, inf  ;;  %vm187_vm3 = vcmp.eq.f32.partialorder %v589_v38, 0.0 }
  0xd2   :  { %v127_v51 = vsel %vm126_vm4, %v98_v26, %v125_v44  ;;  %335 = vrsqrt.f32 %v594_v49  ;;  %vm206_vm4 = vcmp.eq.f32.partialorder %v594_v49, inf }
  0xd3   :  { %v324_v53 = vpop.eup %323  ;;  %v130_v54 = vsel %vm128_vm5, %v129_v45, %v127_v51  ;;  %v113_v55 = vsel %vm112_vm6, %v94_v27, %v111_v47  ;;  %337 = vrsqrt.f32 %v598_v52  ;;  %vm208_vm5 = vcmp.eq.f32.partialorder %v594_v49, 0.0 }
  0xd4   :  { %v326_v57 = vpop.eup %325  ;;  %v116_v59 = vsel %vm114_vm7, %v115_v48, %v113_v55  ;;  %v139_v60 = vmul.f32 %v324_v53, %v575_v28  ;;  %339 = vrcp.f32 %v145_v50  ;;  %v148_v63 = vmax.f32 %v130_v54, 1e-12 }
  0xd5   :  { %v146_v61 = vmax.f32 %v116_v59, 1e-12  ;;  %v132_v62 = vmul.f32 %v326_v57, %v577_v29  ;;  %v209_v50 = vand.u32 2147483648, %v594_v49  ;;  %vm199_vm6 = vcmp.eq.f32.partialorder %v598_v52, inf }
  0xd6   :  { %v141_v3 = vsel %vm140_vm8, %v575_v28, %v139_v60  ;;  %v202_v54 = vand.u32 2147483648, %v598_v52  ;;  %vm201_vm7 = vcmp.eq.f32.partialorder %v598_v52, 0.0 }
  0xd7   :  { %v328_v6 = vpop.eup %327  ;;  %341 = vrcp.f32 %v146_v61  ;;  %v134_v10 = vsel %vm133_vm10, %v577_v29, %v132_v62  ;;  %v144_v18 = vsel %vm142_vm9, %v143_v56, %v141_v3  ;;  %v218_v62 = vld [vmem:[#allocation2 + $0x8] sm:$0xff] }
  0xd8   :  { %v330_v11 = vpop.eup %329  ;;  %v177_v14 = vmul.f32 %v328_v6, %v581_v30  ;;  %343 = vrcp.f32 %v148_v63  ;;  %v137_v23 = vsel %vm135_vm11, %v136_v4, %v134_v10  ;;  %v150_v32 = vmax.f32 %v144_v18, 1e-12  ;;  %v224_v63 = vld [vmem:[#allocation5 + $0x8] sm:$0xff]  ;;  %v217_v4 = vld [vmem:[#allocation2] sm:$0xff]  ;;  %v223_v6 = vld [vmem:[#allocation5] sm:$0xff] }
  0xd9   :  { %v170_v19 = vmul.f32 %v330_v11, %v583_v31  ;;  %345 = vrcp.f32 %v147_v7  ;;  %v149_v36 = vmax.f32 %v137_v23, 1e-12  ;;  %v230_v7 = vadd.f32 %v224_v63, %v218_v62  ;;  %v219_v23 = vld [vmem:[#allocation2 + $0x10] sm:$0xff] }
  0xda   :  { %v179_v24 = vsel %vm178_vm12, %v581_v30, %v177_v14  ;;  %v220_v14 = vld [vmem:[#allocation2 + $0x18] sm:$0xff]  ;;  %v229_v18 = vadd.f32 %v223_v6, %v217_v4 }
  0xdb   :  { %v332_v25 = vpop.eup %331  ;;  %v182_v26 = vsel %vm180_vm13, %v181_v15, %v179_v24  ;;  %v172_v27 = vsel %vm171_vm14, %v583_v31, %v170_v19  ;;  %v188_v31 = vand.u32 2147483648, %v589_v38  ;;  %v226_v15 = vld [vmem:[#allocation5 + $0x18] sm:$0xff]  ;;  %v225_v24 = vld [vmem:[#allocation5 + $0x10] sm:$0xff] }
  0xdc   :  { %v334_v28 = vpop.eup %333  ;;  %v212_v33 = vmax.f32 %v182_v26, 1e-12  ;;  %v175_v34 = vsel %vm173_vm15, %v174_v22, %v172_v27  ;;  %v191_v35 = vmul.f32 %v332_v25, %v587_v37 }
  0xdd   :  { %v211_v29 = vmax.f32 %v175_v34, 1e-12  ;;  %v184_v30 = vmul.f32 %v334_v28, %v589_v38  ;;  %v232_v28 = vadd.f32 %v226_v15, %v220_v14 }
  0xde   :  { %347 = vrcp.f32 %v212_v33  ;;  %v193_v40 = vsel %vm192_vm0, %v587_v37, %v191_v35  ;;  %v231_v35 = vadd.f32 %v225_v24, %v219_v23 }
  0xdf   :  { %349 = vrcp.f32 %v211_v29  ;;  %v196_v41 = vsel %vm194_vm1, %v195_v39, %v193_v40  ;;  %v186_v42 = vsel %vm185_vm2, %v589_v38, %v184_v30  ;;  %v336_v45 = vpop.eup %335 }
  0xe0   :  { %351 = vrcp.f32 %v150_v32  ;;  %v214_v43 = vmax.f32 %v196_v41, 1e-12  ;;  %v189_v44 = vsel %vm187_vm3, %v188_v31, %v186_v42  ;;  %v338_v47 = vpop.eup %337  ;;  %v205_v37 = vmul.f32 %v336_v45, %v594_v49  ;;  %v228_v41 = vld [vmem:[#allocation5 + $0x28] sm:$0xff]  ;;  %v227_v45 = vld [vmem:[#allocation5 + $0x20] sm:$0xff] }
  0xe1   :  { %353 = vrcp.f32 %v149_v36  ;;  %v213_v46 = vmax.f32 %v189_v44, 1e-12  ;;  %v340_v48 = vpop.eup %339  ;;  %v198_v51 = vmul.f32 %v338_v47, %v598_v52  ;;  %v221_v44 = vld [vmem:[#allocation2 + $0x20] sm:$0xff] }
  0xe2   :  { %355 = vrcp.f32 %v214_v43  ;;  %v207_v38 = vsel %vm206_vm4, %v594_v49, %v205_v37  ;;  %v236_v3 = vmul.f32 %v340_v48, %v529_v1 }
  0xe3   :  { %357 = vrcp.f32 %v213_v46  ;;  %v210_v55 = vsel %vm208_vm5, %v209_v50, %v207_v38  ;;  %v200_v56 = vsel %vm199_vm6, %v598_v52, %v198_v51 }
  0xe4   :  { %v342_v53 = vpop.eup %341  ;;  %v216_v57 = vmax.f32 %v210_v55, 1e-12  ;;  %v203_v58 = vsel %vm201_vm7, %v202_v54, %v200_v56  ;;  %v247_v19 = vmul.f32 0.55, %v236_v3 }
  0xe5   :  { %v238_v59 = vmul.f32 %v342_v53, %v537_v5  ;;  %v344_v60 = vpop.eup %343  ;;  %v215_v61 = vmax.f32 %v203_v58, 1e-12  ;;  %v233_v53 = vadd.f32 %v227_v45, %v221_v44 }
  0xe6   :  { %v346_v49 = vpop.eup %345  ;;  %359 = vrcp.f32 %v216_v57  ;;  %v242_v10 = vmul.f32 %v344_v60, %v531_v2  ;;  %v253_v29 = vadd.f32 %v247_v19, %v229_v18 }
  0xe7   :  { %361 = vrcp.f32 %v215_v61  ;;  %v248_v11 = vmul.f32 0.55, %v238_v59  ;;  %v240_v5 = vmul.f32 %v346_v49, %v527_v0 }
  0xe8   :  { %v250_v32 = vmul.f32 0.55, %v242_v10 }
  0xe9   :  { %v254_v2 = vadd.f32 %v248_v11, %v230_v7  ;;  %v249_v36 = vmul.f32 0.55, %v240_v5 }
  0xea   :  { %v256_v46 = vadd.f32 %v250_v32, %v232_v28 }
  0xeb   :  { %v348_v52 = vpop.eup %347  ;;  %v255_v37 = vadd.f32 %v249_v36, %v231_v35 }
  0xec   :  { %v350_v22 = vpop.eup %349  ;;  %v262_v1 = vmul.f32 %v348_v52, %v551_v12  ;;  %v222_v12 = vld [vmem:[#allocation2 + $0x28] sm:$0xff] }
  0xed   :  { %v352_v25 = vpop.eup %351  ;;  %v260_v26 = vmul.f32 %v350_v22, %v553_v13  ;;  %v234_v50 = vadd.f32 %v228_v41, %v222_v12 }
  0xee   :  { %v354_v27 = vpop.eup %353  ;;  %v272_v33 = vmul.f32 0.55, %v262_v1  ;;  %v246_v30 = vmul.f32 %v352_v25, %v543_v8 }
  0xef   :  { %v356_v34 = vpop.eup %355  ;;  %v271_v39 = vmul.f32 0.55, %v260_v26  ;;  %v244_v13 = vmul.f32 %v354_v27, %v545_v9 }
  0xf0   :  { %v358_v0 = vpop.eup %357  ;;  %v266_v40 = vmul.f32 %v356_v34, %v559_v16  ;;  %v278_v31 = vadd.f32 %v272_v33, %v254_v2  ;;  %v252_v8 = vmul.f32 0.55, %v246_v30 }
  0xf1   :  { %v264_v42 = vmul.f32 %v358_v0, %v561_v17  ;;  %v277_v43 = vadd.f32 %v271_v39, %v253_v29  ;;  %v251_v38 = vmul.f32 0.55, %v244_v13 }
  0xf2   :  { %v274_v47 = vmul.f32 0.55, %v266_v40  ;;  %284 = vst [vmem:[#allocation10 + $0x8] sm:$0xff] %v278_v31  ;;  %v258_v56 = vadd.f32 %v252_v8, %v234_v50 }
  0xf3   :  { %v273_v48 = vmul.f32 0.55, %v264_v42  ;;  %283 = vst [vmem:[#allocation10] sm:$0xff] %v277_v43  ;;  %v360_v16 = vpop.eup %359  ;;  %v257_v58 = vadd.f32 %v251_v38, %v233_v53 }
  0xf4   :  { %v280_v51 = vadd.f32 %v274_v47, %v256_v46  ;;  %v362_v55 = vpop.eup %361  ;;  %v270_v9 = vmul.f32 %v360_v16, %v567_v20 }
  0xf5   :  { %v279_v54 = vadd.f32 %v273_v48, %v255_v37  ;;  %v268_v17 = vmul.f32 %v362_v55, %v569_v21 }
  0xf6   :  { %286 = vst [vmem:[#allocation10 + $0x18] sm:$0xff] %v280_v51  ;;  %v276_v57 = vmul.f32 0.55, %v270_v9 }
  0xf7   :  { %285 = vst [vmem:[#allocation10 + $0x10] sm:$0xff] %v279_v54  ;;  %v275_v59 = vmul.f32 0.55, %v268_v17 }
  0xf8   :  { %v282_v60 = vadd.f32 %v276_v57, %v258_v56 }
  0xf9   :  { %v281_v61 = vadd.f32 %v275_v59, %v257_v58 }
  0xfa   :  { %288 = vst [vmem:[#allocation10 + $0x28] sm:$0xff] %v282_v60 }
  0xfb   :  { %287 = vst [vmem:[#allocation10 + $0x20] sm:$0xff] %v281_v61 }
  0xfc   :  { %454 = shalt.err (!%p451_p10)
}
  0xfd   :  { %300 = dma.vmem_to_hbm [thread:$0]  %s295_s3, 768, %s674_s4, [#allocation4], %s473_s20, %s473_s20, %s474_s21  }
  0xfe   :  { %469 = dma.done.wait [#allocation4], 768  }
  0xff   :  { %470 = vsyncadd [#allocation4], 4294966528 }
 0x100   :  { %304 = vsyncpa [#allocation3], 1 }
 0x101   :  { %305 = vsyncpa [#allocation6], 1 }
 0x102   :  { %306 = vsyncpa [#allocation9], 1 }
 0x103   :  { %307 = vsyncpa [#allocation4], 1 }

</bundles_post_ra>
